<compile_context>
chip_gen: v6e
topology: v6e:2x2x1
jax: 0.10.0
libtpu: 0.0.40
codegen_flags: <defaults>
</compile_context>

<pallas_src>
import functools

import jax
import jax.numpy as jnp
from jax.experimental import pallas as pl
from jax.experimental.pallas import tpu as pltpu

EMBEDDING_SIZE = 192   # DINO ViT-small token embedding dim (matches TokenClassifier ctor)
NUM_CLASSES = 4


def _round_up(x, m):
    return (x + m - 1) // m * m


def _device_kind():
    try:
        return jax.devices()[0].device_kind.lower()
    except Exception:
        return ""


def _pick_tile_t(T):
    """Generation-tuned token-tile size (rows per grid step), given the token count."""
    kind = _device_kind()
    if "v5" in kind:
        base, num_cores = 4096, 1          # 2 x 4096 x 192 x 4 B = 6 MiB, under 16 MiB scoped
    elif "v6" in kind:
        base, num_cores = 8192, 1          # 2 x 8192 x 192 x 4 B = 12 MiB, under 32 MiB scoped
    elif "v7" in kind:
        base, num_cores = 4096, 2          # half the VMEM, 2 TensorCores
    else:
        base, num_cores = 4096, 1
    tile = min(base, _round_up(max(T, 1), 8))
    if num_cores > 1:
        # ensure the "parallel" grid axis has at least `num_cores` steps (megacore)
        tile = min(tile, max(8, _round_up(pl.cdiv(max(T, 1), num_cores), 8)))
    return max(8, tile)


def token_classifier_kernel(e_ref, w_ref, b_ref, o_ref):
    # e_ref: (tile_t, D)   w_ref: (D, C)   b_ref: (1, C)   o_ref: (tile_t, C)
    logits = jnp.dot(e_ref[...], w_ref[...], preferred_element_type=jnp.float32)
    o_ref[...] = (logits + b_ref[...]).astype(o_ref.dtype)


@functools.partial(jax.jit, static_argnames=("tile_t",))
def _token_classifier_call(e_flat, w, b, *, tile_t):
    """e_flat: (T, D) any float dtype; w: (D, C); b: (C,) or (1, C).  Returns (T, C) f32."""
    T, D = e_flat.shape
    C = w.shape[1]

    # Tiny params: match the MXU operand dtype of the embeddings; keep bias/acc in f32.
    w = w.astype(e_flat.dtype)
    b = b.reshape(1, C).astype(jnp.float32)

    grid = pl.cdiv(T, tile_t)
    e_bytes = int(jnp.dtype(e_flat.dtype).itemsize)
    cost = pl.CostEstimate(
        flops=2 * T * D * C,
        transcendentals=0,
        bytes_accessed=T * D * e_bytes + D * C * e_bytes + C * 4 + T * C * 4,
    )

    return pl.pallas_call(
        token_classifier_kernel,
        out_shape=jax.ShapeDtypeStruct((T, C), jnp.float32),
        grid_spec=pltpu.PrefetchScalarGridSpec(
            num_scalar_prefetch=0,
            grid=(grid,),
            in_specs=[
                pl.BlockSpec((tile_t, D), lambda i: (i, 0)),  # token tile (streams)
                pl.BlockSpec((D, C), lambda i: (0, 0)),       # full weight, resident
                pl.BlockSpec((1, C), lambda i: (0, 0)),       # bias, resident
            ],
            out_specs=pl.BlockSpec((tile_t, C), lambda i: (i, 0)),  # real-width output
        ),
        compiler_params=pltpu.CompilerParams(
            dimension_semantics=("parallel",)),
        cost_estimate=cost,
    )(e_flat, w, b)


def token_classifier(e_flat, w, b, *, tile_t=None):
    """e_flat: (T, 192) -> (T, 4) logits via the Pallas matmul kernel."""
    T, D = e_flat.shape
    C = w.shape[1]
    assert D == EMBEDDING_SIZE and C == NUM_CLASSES
    if tile_t is None:
        tile_t = _pick_tile_t(T)
    return _token_classifier_call(e_flat, w, b, tile_t=int(tile_t))


def init_classifier_params(key):
    """Deterministic stand-in for nn.Linear(192, 4) init (kaiming-uniform-ish)."""
    kw, kb = jax.random.split(key)
    bound = 1.0 / (EMBEDDING_SIZE ** 0.5)
    # stored as (in, out) = (D, C), i.e. transpose of PyTorch's (out, in)
    w = jax.random.uniform(kw, (EMBEDDING_SIZE, NUM_CLASSES), jnp.float32, -bound, bound)
    b = jax.random.uniform(kb, (NUM_CLASSES,), jnp.float32, -bound, bound)
    return w, b


def dino_model_forward(token_embeddings, w, b, *, tile_t=None):
    """DinoModel.forward with the encoder stage elided (see TODO above).

    token_embeddings: (B, S, 192)  -- what EncoderDino would emit per token
    returns logits:   (B, S, 4)
    """
    B, S, D = token_embeddings.shape
    e_flat = token_embeddings.reshape(B * S, D)
    logits = token_classifier(e_flat, w, b, tile_t=tile_t)
    return logits.reshape(B, S, NUM_CLASSES)


if __name__ == "__main__":
    key = jax.random.PRNGKey(0)
    k_e, k_p = jax.random.split(key)

    # small, deterministic "encoder output": batch=2, seq=8 tokens, embedding=192
    B, S = 2, 8
    e = jax.random.normal(k_e, (B, S, EMBEDDING_SIZE), dtype=jnp.float32)
    w, b = init_classifier_params(k_p)

    ref = jnp.einsum("bsd,dc->bsc", e, w) + b.reshape(1, 1, NUM_CLASSES)

    # f32 path (exact); pin tile_t so the test is independent of device detection
    out = dino_model_forward(e, w, b, tile_t=8)
    out = jax.block_until_ready(out)
    assert out.shape == (B, S, NUM_CLASSES)
    assert jnp.allclose(out, ref, atol=1e-5, rtol=1e-5)

    # auto-tuned tile path (exercises the per-generation tile picker)
    out_auto = jax.block_until_ready(dino_model_forward(e, w, b))
    assert jnp.allclose(out_auto, ref, atol=1e-5, rtol=1e-5)

    # bf16 path: only when the encoder already emits bf16 (no wrapper-side cast pass)
    out_bf16 = jax.block_until_ready(dino_model_forward(e.astype(jnp.bfloat16), w, b))
    assert jnp.allclose(out_bf16, ref, atol=2e-2, rtol=2e-2)

    # non-tile-divisible token count (e.g. B * 197 ViT tokens) exercises the ragged
    # last grid block (no padding pass in the wrapper)
    T_odd = 2 * 197
    e_odd = jax.random.normal(k_e, (T_odd, EMBEDDING_SIZE), dtype=jnp.float32)
    out_odd = jax.block_until_ready(token_classifier(e_odd, w, b, tile_t=256))
    ref_odd = e_odd @ w + b.reshape(1, NUM_CLASSES)
    assert out_odd.shape == (T_odd, NUM_CLASSES)
    assert jnp.allclose(out_odd, ref_odd, atol=1e-5, rtol=1e-5)

    print("KERNEL_OK")
</pallas_src>

<mosaic_0001>
module attributes {stable_mosaic.version = 11 : i64} {
  func.func @token_classifier_kernel(%arg0: i32, %arg1: memref<8x192xf32, #tpu.memory_space<vmem>>, %arg2: memref<192x4xf32, #tpu.memory_space<vmem>>, %arg3: memref<1x4xf32, #tpu.memory_space<vmem>>, %arg4: memref<8x4xf32, #tpu.memory_space<vmem>>) attributes {dimension_semantics = [#tpu.dimension_semantics<parallel>], iteration_bounds = array<i64: 2>, scalar_prefetch = 0 : i64, scratch_operands = 0 : i64, tpu.core_type = #tpu.core_type<tc>, window_params = [{transform_indices = @transform_0, window_bounds = array<i64: 8, 192>}, {pipeline_mode = #tpu.pipeline_mode<synchronous>, transform_indices = @transform_1, window_bounds = array<i64: 192, 4>}, {pipeline_mode = #tpu.pipeline_mode<synchronous>, transform_indices = @transform_2, window_bounds = array<i64: 1, 4>}, {transform_indices = @transform_3, window_bounds = array<i64: 8, 4>}]} {
    %c0 = arith.constant 0 : index
    %c0_0 = arith.constant 0 : index
    %0 = vector.load %arg1[%c0, %c0_0] : memref<8x192xf32, #tpu.memory_space<vmem>>, vector<8x192xf32>
    %c0_1 = arith.constant 0 : index
    %c0_2 = arith.constant 0 : index
    %1 = vector.load %arg2[%c0_1, %c0_2] : memref<192x4xf32, #tpu.memory_space<vmem>>, vector<192x4xf32>
    %cst = arith.constant dense<0.000000e+00> : vector<8x4xf32>
    %2 = tpu.matmul %0, %1, %cst {dimension_numbers = #tpu.dot_dimension_numbers<[1], [0], [0], [1], [0, 0, 1, 1], [], []>} : vector<8x192xf32>, vector<192x4xf32>, vector<8x4xf32> -> vector<8x4xf32>
    %c0_3 = arith.constant 0 : index
    %c0_4 = arith.constant 0 : index
    %3 = vector.load %arg3[%c0_3, %c0_4] : memref<1x4xf32, #tpu.memory_space<vmem>>, vector<1x4xf32>
    %4 = vector.broadcast %3 : vector<1x4xf32> to vector<8x4xf32>
    %5 = arith.addf %2, %4 : vector<8x4xf32>
    %c0_5 = arith.constant 0 : index
    %c0_6 = arith.constant 0 : index
    %6 = vector.load %arg4[%c0_5, %c0_6] : memref<8x4xf32, #tpu.memory_space<vmem>>, vector<8x4xf32>
    tpu.vector_store %arg4[%c0_5, %c0_6], %5 {strides = array<i32>} : memref<8x4xf32, #tpu.memory_space<vmem>>, vector<8x4xf32>,
    return
  }
  func.func @transform_0(%arg0: i32) -> (i32, i32) {
    %c0_i32 = arith.constant 0 : i32
    %c0_i32_0 = arith.constant 0 : i32
    return %arg0, %c0_i32 : i32, i32
  }
  func.func @transform_1(%arg0: i32) -> (i32, i32) {
    %c0_i32 = arith.constant 0 : i32
    %c0_i32_0 = arith.constant 0 : i32
    %c0_i32_1 = arith.constant 0 : i32
    return %c0_i32, %c0_i32_0 : i32, i32
  }
  func.func @transform_2(%arg0: i32) -> (i32, i32) {
    %c0_i32 = arith.constant 0 : i32
    %c0_i32_0 = arith.constant 0 : i32
    %c0_i32_1 = arith.constant 0 : i32
    return %c0_i32, %c0_i32_0 : i32, i32
  }
  func.func @transform_3(%arg0: i32) -> (i32, i32) {
    %c0_i32 = arith.constant 0 : i32
    %c0_i32_0 = arith.constant 0 : i32
    return %arg0, %c0_i32 : i32, i32
  }
}

</mosaic_0001>

<bundles_post_ra>
// kernel: _token_classifier_call.1
= control target key start
LH: loop header
LB: loop body
LE: loop exit
PB: predicated region body
PF: predicated region fallthrough
CT: control target
= control target key end

     0   :  { %s382_s12 = smov 0   ;;  %s506_s0 = inlined_call_operand.vmem [shape: f32[16,192], index: 0, kind: input, shape index: {}]   ;;  %s507_s1 = inlined_call_operand.vmem [shape: f32[192,4], index: 1, kind: input, shape index: {}]   ;;  %s508_s2 = inlined_call_operand.vmem [shape: f32[1,4], index: 2, kind: input, shape index: {}]   ;;  %s509_s3 = inlined_call_operand.vmem [shape: f32[16,4], index: 3, kind: output, shape index: {}]  }
   0x1 LB: > { %s331_s13 = sadd.s32 4294967295, %s359_s12   ;;  %p335_p0 = scmp.ge.s32.totalorder %s359_s12, 1  ;;  %s359_s12 = sphi %s382_s12, %s13_s12  }
   0x2   : > { %p137_p1 = scmp.lt.s32.totalorder %s359_s12, 3 }
   0x4   : > { %p138_p2 = pnand %p335_p0, %p137_p1 }
   0x5   : > { %p160_p3 = scmp.lt.s32.totalorder (!%p138_p2), %s331_s13, 1 }
   0x6   : > { %141 = sbr.rel (%p138_p2) target bundleno = 256 (0x100), region = 32 }
   0xb   : > { %v186_v0 = vld [vmem:[%s507_s1 + $0x78] sm:$0xff]  ;;  %v361_v1 = vmov 0.0   ;;  %v185_v2 = vld [vmem:[%s507_s1 + $0x70] sm:$0xff]  ;;  %s511_s13 = smov (!%p160_p3, %s331_s13), 1  ;;  %v184_v3 = vld [vmem:[%s507_s1 + $0x68] sm:$0xff]  ;;  %vm202_vm0 = vcmask 523264  }
   0xc   : > { %206 = vmatprep.subr.mxu0 %v361_v1  ;;  %s343_s20 = sshll.u32 %s511_s13, 4  ;;  %v183_v4 = vld [vmem:[%s507_s1 + $0x60] sm:$0xff]  ;;  %v182_v5 = vld [vmem:[%s507_s1 + $0x58] sm:$0xff]  ;;  %v181_v7 = vld [vmem:[%s507_s1 + $0x50] sm:$0xff]  ;;  %s338_s17 = sshll.u32 %s511_s13, 3  ;;  %vm276_vm1 = vcmask 31744  }
   0xd   : > { %207 = vmatpush1.msra.mxu0 %v186_v0  ;;  %s411_s25 = scalar_lea.vmem %s506_s0, %s343_s20  ;;  %v180_v8 = vld [vmem:[%s507_s1 + $0x48] sm:$0xff]  ;;  %v179_v9 = vld [vmem:[%s507_s1 + $0x40] sm:$0xff]  ;;  %v178_v10 = vld [vmem:[%s507_s1 + $0x38] sm:$0xff]  ;;  %s168_s22 = scalar_lea.vmem %s509_s3, %s338_s17 }
   0xe   : > { %208 = vmatprep.subr.mxu0 %v361_v1  ;;  %v170_v6 = vld [vmem:[%s411_s25 + $0x8] sm:$0xff]  ;;  %v177_v11 = vld [vmem:[%s507_s1 + $0x30] sm:$0xff]  ;;  %v175_v13 = vld [vmem:[%s507_s1 + $0x20] sm:$0xff] }
   0xf   : > { %209 = vmatpush1.msra.mxu0 %v185_v2  ;;  %340 = vmatprep.mubr.msk.f32.mxu0 %vm202_vm0, %v170_v6  ;;  %v176_v12 = vld [vmem:[%s507_s1 + $0x28] sm:$0xff]  ;;  %v174_v14 = vld [vmem:[%s507_s1 + $0x18] sm:$0xff]  ;;  %v173_v15 = vld [vmem:[%s507_s1 + $0x10] sm:$0xff] }
  0x10   : > { %210 = vmatprep.subr.mxu0 %v361_v1  ;;  %v172_v16 = vld [vmem:[%s507_s1 + $0x8] sm:$0xff]  ;;  %v171_v17 = vld [vmem:[%s507_s1] sm:$0xff]  ;;  %v194_v18 = vld [vmem:[%s507_s1 + $0xb8] sm:$0xff] }
  0x11   : > { %211 = vmatpush1.msra.mxu0 %v184_v3  ;;  %v193_v19 = vld [vmem:[%s507_s1 + $0xb0] sm:$0xff]  ;;  %v192_v20 = vld [vmem:[%s507_s1 + $0xa8] sm:$0xff]  ;;  %v191_v21 = vld [vmem:[%s507_s1 + $0xa0] sm:$0xff] }
  0x12   : > { %212 = vmatprep.subr.mxu0 %v361_v1  ;;  %v190_v22 = vld [vmem:[%s507_s1 + $0x98] sm:$0xff]  ;;  %v189_v23 = vld [vmem:[%s507_s1 + $0x90] sm:$0xff]  ;;  %v188_v24 = vld [vmem:[%s507_s1 + $0x88] sm:$0xff] }
  0x13   : > { %213 = vmatpush1.msra.mxu0 %v183_v4  ;;  %v187_v25 = vld [vmem:[%s507_s1 + $0x80] sm:$0xff] }
  0x14   : > { %214 = vmatprep.subr.mxu0 %v361_v1  ;;  %v169_v26 = vld [vmem:[%s411_s25] sm:$0xff] }
  0x15   : > { %215 = vmatpush1.msra.mxu0 %v182_v5  ;;  %v339_v27 = vld [vmem:[%s508_s2] ss:$0 sm:$0xff] }
  0x16   : > { %216 = vmatprep.subr.mxu0 %v361_v1 }
  0x17   : > { %217 = vmatpush1.msra.mxu0 %v181_v7 }
  0x18   : > { %218 = vmatprep.subr.mxu0 %v361_v1 }
  0x19   : > { %219 = vmatpush1.msra.mxu0 %v180_v8 }
  0x1a   : > { %220 = vmatprep.subr.mxu0 %v361_v1 }
  0x1b   : > { %221 = vmatpush1.msra.mxu0 %v179_v9 }
  0x1c   : > { %222 = vmatprep.subr.mxu0 %v361_v1 }
  0x1d   : > { %223 = vmatpush1.msra.mxu0 %v178_v10 }
  0x1e   : > { %224 = vmatprep.subr.mxu0 %v361_v1 }
  0x1f   : > { %225 = vmatpush1.msra.mxu0 %v177_v11 }
  0x20   : > { %226 = vmatprep.subr.mxu0 %v361_v1 }
  0x21   : > { %227 = vmatpush1.msra.mxu0 %v176_v12 }
  0x22   : > { %228 = vmatprep.subr.mxu0 %v361_v1 }
  0x23   : > { %229 = vmatpush1.msra.mxu0 %v175_v13 }
  0x24   : > { %230 = vmatprep.subr.mxu0 %v361_v1 }
  0x25   : > { %231 = vmatpush1.msra.mxu0 %v174_v14 }
  0x26   : > { %232 = vmatprep.subr.mxu0 %v361_v1 }
  0x27   : > { %233 = vmatpush1.msra.mxu0 %v173_v15 }
  0x28   : > { %234 = vmatprep.subr.mxu0 %v361_v1 }
  0x29   : > { %235 = vmatpush1.msra.mxu0 %v172_v16 }
  0x2a   : > { %236 = vmatprep.subr.mxu0 %v361_v1 }
  0x2b   : > { %237 = vmatpush1.msra.mxu0 %v171_v17 }
  0x2c   : > { %254 = vmatprep.subr.mxu0 %v361_v1 }
  0x2d   : > { %255 = vmatpush2.msra.mxu0 %v194_v18 }
  0x2e   : > { %256 = vmatprep.subr.mxu0 %v361_v1 }
  0x2f   : > { %257 = vmatpush2.msra.mxu0 %v193_v19 }
  0x30   : > { %258 = vmatprep.subr.mxu0 %v361_v1 }
  0x31   : > { %259 = vmatpush2.msra.mxu0 %v192_v20 }
  0x32   : > { %260 = vmatprep.subr.mxu0 %v361_v1 }
  0x33   : > { %261 = vmatpush2.msra.mxu0 %v191_v21 }
  0x34   : > { %262 = vmatprep.subr.mxu0 %v361_v1 }
  0x35   : > { %263 = vmatpush2.msra.mxu0 %v190_v22 }
  0x36   : > { %264 = vmatprep.subr.mxu0 %v361_v1 }
  0x37   : > { %265 = vmatpush2.msra.mxu0 %v189_v23 }
  0x38   : > { %266 = vmatprep.subr.mxu0 %v361_v1 }
  0x39   : > { %267 = vmatpush2.msra.mxu0 %v188_v24 }
  0x3a   : > { %268 = vmatprep.subr.mxu0 %v361_v1 }
  0x3b   : > { %269 = vmatpush2.msra.mxu0 %v187_v25 }
  0x3c   : > { %271 = vmatmul.mubr.f32.vlgmr.msra.gmra.mxu0 %v169_v26 }
  0xfc   : > { %v272_v28 = vpop.f32.mrf.mxu0 }
  0xfd   : > { %v273_v29 = vadd.f32 %v339_v27, %v272_v28 }
  0xfe   : > { %v274_v30 = vpop.f32.mrf.mxu0 }
  0xff   : > { %277 = vst.msk [vmem:[%s168_s22] sm:$0xff] %vm276_vm1, %v273_v29 }
 0x100 PF: > { %s13_s12 = sadd.s32 1, %s359_s12  }
 0x101   : > { %p10_p4 = scmp.ge.s32.totalorder %s13_s12, 4  }
 0x103   :  { %12 = sbr.rel (!%p10_p4) target bundleno = 1 (0x1), region = 62 }

</bundles_post_ra>
